<compile_context>
chip_gen: v7x
topology: tpu7x:2x2x1
jax: 0.10.0
libtpu: 0.0.40
codegen_flags: <defaults>
</compile_context>

<pallas_src>
import math

import jax
import jax.numpy as jnp
from jax.experimental import pallas as pl
from jax.experimental.pallas import tpu as pltpu

_HALF_LOG_TWO_PI = math.log(2.0 * math.pi) / 2.0


def _gaussian_logprob_kernel(x_ref, mean_ref, log_std_ref, o_ref):
    # Parameter-derived math stays O(D) per tile (computed once on (1, D)).
    log_std = log_std_ref[...]                       # (1, D)
    inv_two_var = 0.5 * jnp.exp(-2.0 * log_std)      # 1 / (2 * exp(2*log_std))
    c = log_std + _HALF_LOG_TWO_PI                   # folded additive constant

    # Elementwise hot path on the (tb, D) tile: VPU only, streams from/to VMEM.
    diff = x_ref[...] - mean_ref[...]
    o_ref[...] = -(diff * diff * inv_two_var + c)


def gaussian_log_prob(x, mean, log_std, *, block_batch=1024,
                      vmem_budget_bytes=16 * 1024 * 1024):
    """x: (B, D) float32; mean, log_std: (D,) float32 -> (B, D) float32."""
    B, D = x.shape
    dtype = x.dtype

    # --- Lane-dense last dim: pad D up to a multiple of 128. ---------------
    D_pad = max(128, ((D + 127) // 128) * 128)

    # --- Tile sizing: largest batch tile that fits a conservative VMEM ------
    # budget (4 buffers: double-buffered input + double-buffered output).
    bytes_per_row = D_pad * 4  # f32 compute/storage
    max_rows = max(8, ((vmem_budget_bytes // (4 * bytes_per_row)) // 8) * 8)
    tb = max(8, (min(block_batch, max_rows) // 8) * 8)
    # Don't make the tile bigger than the (rounded-up) batch itself.
    tb = min(tb, max(8, ((B + 7) // 8) * 8))

    # --- Pad batch to a multiple of the tile (replaces the hard assert). ----
    num_tiles = pl.cdiv(B, tb)
    B_pad = num_tiles * tb

    x_p = x
    if (B_pad != B) or (D_pad != D):
        x_p = jnp.pad(x, ((0, B_pad - B), (0, D_pad - D)))
    mean_p = jnp.pad(mean, (0, D_pad - D)).reshape(1, D_pad).astype(dtype)
    log_std_p = jnp.pad(log_std, (0, D_pad - D)).reshape(1, D_pad).astype(dtype)

    out = pl.pallas_call(
        _gaussian_logprob_kernel,
        out_shape=jax.ShapeDtypeStruct((B_pad, D_pad), dtype),
        grid_spec=pltpu.PrefetchScalarGridSpec(
            num_scalar_prefetch=0,
            grid=(num_tiles,),
            in_specs=[
                pl.BlockSpec((tb, D_pad), lambda i: (i, 0)),   # X tile
                pl.BlockSpec((1, D_pad), lambda i: (0, 0)),    # mean (resident)
                pl.BlockSpec((1, D_pad), lambda i: (0, 0)),    # log_std (resident)
            ],
            out_specs=pl.BlockSpec((tb, D_pad), lambda i: (i, 0)),
        ),
        compiler_params=pltpu.CompilerParams(
            dimension_semantics=("parallel",),
            vmem_limit_bytes=64 * 1024 * 1024,
        ),
    )(x_p, mean_p, log_std_p)

    if (B_pad != B) or (D_pad != D):
        out = out[:B, :D]
    return out


if __name__ == "__main__":
    key = jax.random.PRNGKey(0)
    kx, km, ks = jax.random.split(key, 3)

    # Small shapes consistent with the module; D=32 / B=16 also exercises the
    # lane-padding and batch-rounding paths.
    B, D = 16, 32
    x = jax.random.normal(kx, (B, D), dtype=jnp.float32)

    # Gaussian.__init__(dim) uses zeros; use small random params here to give
    # the correctness check real coverage of the mean/log_std terms.
    mean = 0.1 * jax.random.normal(km, (D,), dtype=jnp.float32)
    log_std = 0.1 * jax.random.normal(ks, (D,), dtype=jnp.float32)

    log_prob = gaussian_log_prob(x, mean, log_std)
    jax.block_until_ready(log_prob)

    # Pure-JAX reference (same formula as the PyTorch module).
    ref = -(
        (x - mean[None, :]) ** 2 / (2.0 * jnp.exp(2.0 * log_std[None, :]))
        + math.log(2.0 * math.pi) / 2.0
        + log_std[None, :]
    )
    assert log_prob.shape == (B, D)
    assert jnp.allclose(log_prob, ref, atol=1e-5, rtol=1e-5)

    print("KERNEL_OK")
</pallas_src>

<mosaic_0001>
module attributes {stable_mosaic.version = 11 : i64} {
  func.func @_gaussian_logprob_kernel(%arg0: i32, %arg1: memref<16x128xf32, #tpu.memory_space<vmem>>, %arg2: memref<1x128xf32, #tpu.memory_space<vmem>>, %arg3: memref<1x128xf32, #tpu.memory_space<vmem>>, %arg4: memref<16x128xf32, #tpu.memory_space<vmem>>) attributes {dimension_semantics = [#tpu.dimension_semantics<parallel>], iteration_bounds = array<i64: 1>, scalar_prefetch = 0 : i64, scratch_operands = 0 : i64, tpu.core_type = #tpu.core_type<tc>, window_params = [{transform_indices = @transform_0, window_bounds = array<i64: 16, 128>}, {pipeline_mode = #tpu.pipeline_mode<synchronous>, transform_indices = @transform_1, window_bounds = array<i64: 1, 128>}, {pipeline_mode = #tpu.pipeline_mode<synchronous>, transform_indices = @transform_2, window_bounds = array<i64: 1, 128>}, {transform_indices = @transform_3, window_bounds = array<i64: 16, 128>}]} {
    %c0 = arith.constant 0 : index
    %c0_0 = arith.constant 0 : index
    %0 = vector.load %arg3[%c0, %c0_0] : memref<1x128xf32, #tpu.memory_space<vmem>>, vector<1x128xf32>
    %cst = arith.constant -2.000000e+00 : f32
    %1 = vector.broadcast %cst : f32 to vector<1x128xf32>
    %2 = arith.mulf %1, %0 : vector<1x128xf32>
    %3 = math.exp %2 : vector<1x128xf32>
    %cst_1 = arith.constant 5.000000e-01 : f32
    %4 = vector.broadcast %cst_1 : f32 to vector<1x128xf32>
    %5 = arith.mulf %4, %3 : vector<1x128xf32>
    %cst_2 = arith.constant 0.918938517 : f32
    %6 = vector.broadcast %cst_2 : f32 to vector<1x128xf32>
    %7 = arith.addf %0, %6 : vector<1x128xf32>
    %c0_3 = arith.constant 0 : index
    %c0_4 = arith.constant 0 : index
    %8 = vector.load %arg1[%c0_3, %c0_4] : memref<16x128xf32, #tpu.memory_space<vmem>>, vector<16x128xf32>
    %c0_5 = arith.constant 0 : index
    %c0_6 = arith.constant 0 : index
    %9 = vector.load %arg2[%c0_5, %c0_6] : memref<1x128xf32, #tpu.memory_space<vmem>>, vector<1x128xf32>
    %10 = vector.broadcast %9 : vector<1x128xf32> to vector<16x128xf32>
    %11 = arith.subf %8, %10 : vector<16x128xf32>
    %12 = arith.mulf %11, %11 : vector<16x128xf32>
    %13 = vector.broadcast %5 : vector<1x128xf32> to vector<16x128xf32>
    %14 = arith.mulf %12, %13 : vector<16x128xf32>
    %15 = vector.broadcast %7 : vector<1x128xf32> to vector<16x128xf32>
    %16 = arith.addf %14, %15 : vector<16x128xf32>
    %cst_7 = arith.constant 0.000000e+00 : f32
    %17 = vector.broadcast %cst_7 : f32 to vector<16x128xf32>
    %18 = arith.subf %17, %16 : vector<16x128xf32>
    %c0_8 = arith.constant 0 : index
    %c0_9 = arith.constant 0 : index
    %19 = vector.load %arg4[%c0_8, %c0_9] : memref<16x128xf32, #tpu.memory_space<vmem>>, vector<16x128xf32>
    tpu.vector_store %arg4[%c0_8, %c0_9], %18 {strides = array<i32>} : memref<16x128xf32, #tpu.memory_space<vmem>>, vector<16x128xf32>,
    return
  }
  func.func @transform_0(%arg0: i32) -> (i32, i32) {
    %c0_i32 = arith.constant 0 : i32
    %c0_i32_0 = arith.constant 0 : i32
    return %arg0, %c0_i32 : i32, i32
  }
  func.func @transform_1(%arg0: i32) -> (i32, i32) {
    %c0_i32 = arith.constant 0 : i32
    %c0_i32_0 = arith.constant 0 : i32
    %c0_i32_1 = arith.constant 0 : i32
    return %c0_i32, %c0_i32_0 : i32, i32
  }
  func.func @transform_2(%arg0: i32) -> (i32, i32) {
    %c0_i32 = arith.constant 0 : i32
    %c0_i32_0 = arith.constant 0 : i32
    %c0_i32_1 = arith.constant 0 : i32
    return %c0_i32, %c0_i32_0 : i32, i32
  }
  func.func @transform_3(%arg0: i32) -> (i32, i32) {
    %c0_i32 = arith.constant 0 : i32
    %c0_i32_0 = arith.constant 0 : i32
    return %arg0, %c0_i32 : i32, i32
  }
}

</mosaic_0001>

<bundles_post_ra>
// kernel: tpu_custom_call.1
= control target key start
LH: loop header
LB: loop body
LE: loop exit
PB: predicated region body
PF: predicated region fallthrough
CT: control target
= control target key end

     0   :  { %8 = vsyncpa [#allocation3], 0  ;;  %s299_s0 = inlined_call_operand.hbm [shape: f32[16,128], index: 0, kind: input, shape index: {}]   ;;  %s300_s1 = inlined_call_operand.hbm [shape: f32[1,128], index: 1, kind: input, shape index: {}]   ;;  %s301_s2 = inlined_call_operand.hbm [shape: f32[1,128], index: 2, kind: input, shape index: {}]   ;;  %s302_s3 = inlined_call_operand.hbm [shape: f32[16,128], index: 3, kind: output, shape index: {}]  }
   0x1   :  { %9 = vsyncpa [#allocation6], 0 }
   0x2   :  { %10 = vsyncpa [#allocation4], 0  ;;  %s212_s12 = smov [#allocation5]   ;;  %s213_s14 = smov [#allocation2]  }
   0x3   :  { %s29_s13 = sshll.u32 %s212_s12, 4  ;;  %s16_s15 = sshll.u32 %s213_s14, 4  ;;  %s30_s13 = int_to_ptr.vmem [resolvable:$true] %s29_s13  ;;  %s238_s15 = int_to_ptr.vmem [resolvable:$true] %s16_s15 }
   0x4   :  { %s118_s18 = scalar_lea.hbm %s300_s1, 16 }
   0x5   :  { %p119_p0 = scmp.ne.s32.totalorder %s300_s1, %s118_s18  ;;  %p122_p1 = scmp.lt.u32.totalorder %s118_s18, %s300_s1 }
   0x7   :  { %p124_p2 = pnand %p122_p1, %p119_p0 }
   0x9   :  { %127 = shalt.err (!%p124_p2)
}
   0xa   :  { %s128_s23 = scalar_lea.vmem %s30_s13, 16  ;;  %s132_s24 = scalar_lea.vmem %s30_s13, 32 }
   0xb   :  { %p129_p3 = scmp.ne.s32.totalorder %s30_s13, %s128_s23  ;;  %p133_p4 = scmp.lt.s32.totalorder %s30_s13, %s30_s13 }
   0xc   :  { %p134_p5 = scmp.lt.s32.totalorder %s132_s24, %s128_s23 }
   0xe   :  { %p135_p6 = por %p134_p5, %p133_p4 }
  0x10   :  { %p136_p7 = pnand %p135_p6, %p129_p3 }
  0x12   :  { %139 = shalt.err (!%p136_p7)
}
  0x13   :  { %32 = dma.hbm_to_vmem [thread:$0]  %s300_s1, 16, %s30_s13, [#allocation6]  }
  0x14   :  { %s140_s29 = scalar_lea.hbm %s299_s0, 256 }
  0x15   :  { %p141_p8 = scmp.ne.s32.totalorder %s299_s0, %s140_s29  ;;  %p144_p9 = scmp.lt.u32.totalorder %s140_s29, %s299_s0 }
  0x17   :  { %p146_p10 = pnand %p144_p9, %p141_p8 }
  0x19   :  { %149 = shalt.err (!%p146_p10)
}
  0x1a   :  { %s150_s7 = scalar_lea.vmem %s238_s15, 256  ;;  %p155_p12 = scmp.lt.s32.totalorder %s238_s15, %s238_s15 }
  0x1b   :  { %p151_p11 = scmp.ne.s32.totalorder %s238_s15, %s150_s7  ;;  %p156_p13 = scmp.lt.s32.totalorder %s150_s7, %s150_s7 }
  0x1d   :  { %p157_p0 = por %p156_p13, %p155_p12 }
  0x1f   :  { %p158_p1 = pnand %p157_p0, %p151_p11 }
  0x21   :  { %161 = shalt.err (!%p158_p1)
}
  0x22   :  { %s214_s1 = smov 128   ;;  %s215_s8 = smov 8  }
  0x23   :  { %22 = dma.hbm_to_vmem [thread:$0]  %s299_s0, 256, %s238_s15, [#allocation3], %s214_s1, %s214_s1, %s215_s8  }
  0x24   :  { %s216_s11 = smov [#allocation7]   ;;  %s162_s16 = scalar_lea.hbm %s301_s2, 16 }
  0x25   :  { %s39_s12 = sshll.u32 %s216_s11, 4  ;;  %p163_p2 = scmp.ne.s32.totalorder %s301_s2, %s162_s16  ;;  %s40_s12 = int_to_ptr.vmem [resolvable:$true] %s39_s12 }
  0x26   :  { %p166_p3 = scmp.lt.u32.totalorder %s162_s16, %s301_s2 }
  0x28   :  { %p168_p4 = pnand %p166_p3, %p163_p2 }
  0x2a   :  { %171 = shalt.err (!%p168_p4)
}
  0x2b   :  { %s172_s21 = scalar_lea.vmem %s40_s12, 16  ;;  %s176_s0 = scalar_lea.vmem %s40_s12, 32 }
  0x2c   :  { %p173_p5 = scmp.ne.s32.totalorder %s40_s12, %s172_s21  ;;  %p177_p6 = scmp.lt.s32.totalorder %s40_s12, %s40_s12 }
  0x2d   :  { %p178_p7 = scmp.lt.s32.totalorder %s176_s0, %s172_s21 }
  0x2f   :  { %p179_p8 = por %p178_p7, %p177_p6 }
  0x31   :  { %p180_p9 = pnand %p179_p8, %p173_p5 }
  0x33   :  { %183 = shalt.err (!%p180_p9)
}
  0x34   :  { %42 = dma.hbm_to_vmem [thread:$0]  %s301_s2, 16, %s40_s12, [#allocation6]  }
  0x35   :  { %206 = dma.done.wait [#allocation3], 256  }
  0x36   :  { %207 = vsyncadd [#allocation3], 4294967040 }
  0x37   :  { %208 = dma.done.wait [#allocation6], 32  }
  0x38   :  { %209 = vsyncadd [#allocation6], 4294967264  ;;  %v52_v0 = vld [vmem:[#allocation7] sm:$0x1]  ;;  %v72_v3 = vlaneseq  ;;  %v58_v4 = vld [vmem:[#allocation2] sm:$0xff]  ;;  %s217_s2 = smov [#allocation8]  }
  0x39   :  { %v53_v1 = vmul.f32 -2.0, %v52_v0  ;;  %v109_v5 = vld [vmem:[#allocation5] ss:$0 sm:$0xff]  ;;  %v59_v6 = vld [vmem:[#allocation2 + $0x8] sm:$0xff]  ;;  %v57_v10 = vadd.f32 0.9189385, %v52_v0 }
  0x3a   :  { %v73_v7 = vshrl.u32 %v72_v3, 7  ;;  %v67_v8 = vsub.f32 %v58_v4, %v109_v5  ;;  %v68_v9 = vsub.f32 %v59_v6, %v109_v5  ;;  %s96_s23 = sshll.u32 %s217_s2, 4  ;;  %s97_s23 = int_to_ptr.vmem [resolvable:$true] %s96_s23 }
  0x3b   :  { %v54_v2 = vmul.f32 1.442695, %v53_v1  ;;  %s184_s24 = scalar_lea.vmem %s97_s23, 256  ;;  %p189_p11 = scmp.lt.s32.totalorder %s97_s23, %s97_s23 }
  0x3c   :  { %v74_v11 = vsub.s32 0, %v73_v7  ;;  %v69_v14 = vmul.f32 %v67_v8, %v67_v8  ;;  %v70_v15 = vmul.f32 %v68_v9, %v68_v9  ;;  %p185_p10 = scmp.ne.s32.totalorder %s97_s23, %s184_s24  ;;  %p190_p12 = scmp.lt.s32.totalorder %s184_s24, %s184_s24 }
  0x3d   :  { %116 = vpow2.f32 %v54_v2 }
  0x3e   :  { %v83_v17 = vrot.slane %v57_v10, %v74_v11  ;;  %p191_p13 = por %p190_p12, %p189_p11 }
  0x40   :  { %p192_p0 = pnand %p191_p13, %p185_p10 }
  0x47   :  { %v117_v12 = vpop.eup %116 }
  0x48   :  { %v56_v13 = vmul.f32 0.5, %v117_v12 }
  0x4a   :  { %v75_v16 = vrot.slane %v56_v13, %v74_v11 }
  0x4c   :  { %v77_v18 = vmul.f32 %v75_v16, %v69_v14  ;;  %v78_v19 = vmul.f32 %v75_v16, %v70_v15 }
  0x4e   :  { %v85_v20 = vadd.f32 %v83_v17, %v77_v18  ;;  %v86_v21 = vadd.f32 %v83_v17, %v78_v19 }
  0x50   :  { %v87_v22 = vsub.f32 0.0, %v85_v20  ;;  %v88_v23 = vsub.f32 0.0, %v86_v21 }
  0x52   :  { %89 = vst [vmem:[#allocation8] sm:$0xff] %v87_v22  ;;  %90 = vst [vmem:[#allocation8 + $0x8] sm:$0xff] %v88_v23 }
  0x53   :  { %195 = shalt.err (!%p192_p0)
}
  0x54   :  { %s196_s27 = scalar_lea.hbm %s302_s3, 256 }
  0x55   :  { %p197_p1 = scmp.ne.s32.totalorder %s302_s3, %s196_s27  ;;  %p200_p2 = scmp.lt.u32.totalorder %s196_s27, %s302_s3 }
  0x57   :  { %p202_p3 = pnand %p200_p2, %p197_p1 }
  0x59   :  { %205 = shalt.err (!%p202_p3)
}
  0x5a   :  { %102 = dma.vmem_to_hbm [thread:$0]  %s97_s23, 256, %s302_s3, [#allocation4], %s214_s1, %s214_s1, %s215_s8  }
  0x5b   :  { %210 = dma.done.wait [#allocation4], 256  }
  0x5c   :  { %211 = vsyncadd [#allocation4], 4294967040 }
  0x5d   :  { %106 = vsyncpa [#allocation3], 1 }
  0x5e   :  { %107 = vsyncpa [#allocation6], 1 }
  0x5f   :  { %108 = vsyncpa [#allocation4], 1 }

</bundles_post_ra>
